<compile_context>
chip_gen: v7x
topology: tpu7x:2x2x1
jax: 0.10.0
libtpu: 0.0.40
codegen_flags: <defaults>
</compile_context>

<pallas_src>
import functools

import numpy as np
import jax
import jax.numpy as jnp
from jax.experimental import pallas as pl
from jax.experimental.pallas import tpu as pltpu


def _prefers_f32_upcast():
    # v5e has no bf16 VPU path: keep the upfront f32 cast there.  v6e/v7x do
    # the subtract in the streamed dtype and upcast only for square+accumulate.
    try:
        kind = jax.devices()[0].device_kind.lower()
    except Exception:
        return False
    return ("v5 lite" in kind) or ("v5e" in kind) or ("v5lite" in kind)


def _uwcs_kernel(margin, upcast_first,
                 o1_ref, o2_ref, f1_ref, f2_ref, c_ref, out_ref):
    if upcast_first:
        diff = o2_ref[...].astype(jnp.float32) - o1_ref[...].astype(jnp.float32)
        fdiff = f1_ref[...].astype(jnp.float32) - f2_ref[...].astype(jnp.float32)
    else:
        # Subtract in the streamed dtype (bf16 on v6e/v7x), upcast for squares.
        diff = (o2_ref[...] - o1_ref[...]).astype(jnp.float32)
        fdiff = (f1_ref[...] - f2_ref[...]).astype(jnp.float32)

    distances = jnp.sum(diff * diff, axis=1, keepdims=True)       # (tb, 1) f32
    featuredis = jnp.sum(fdiff * fdiff, axis=1, keepdims=True)    # (tb, 1) f32

    c = c_ref[...]                    # (tb, 2) f32: [target*cm, (1-target)^2]
    c0 = c[:, 0:1]
    c1 = c[:, 1:2]

    # Keep approx=False: kernel is HBM-bound, exact divide costs nothing here.
    inv_fd = pl.reciprocal(featuredis, approx=False)
    row = distances * c0 * inv_fd                                 # (tb, 1)
    t2 = c1 * jnp.maximum(margin - distances, 0.0) * featuredis   # (tb, 1)

    row_sum = jnp.sum(row)
    t2_sum = jnp.sum(t2)

    # Lane-dense (1,128) partial-sum block: lane 0 = row partial, lane 1 = t2.
    lane = jax.lax.broadcasted_iota(jnp.int32, out_ref.shape, 1)
    out_ref[...] = jnp.where(lane == 0, row_sum,
                             jnp.where(lane == 1, t2_sum, 0.0))


def uwcs_loss_pallas(output1, output2, feat1, feat2, target, cm_gathered,
                     label1, label2, margin, global_mean, size_average=True):
    B, D = output1.shape
    _, F = feat1.shape

    # Big streams in natural layout/dtype (bf16 in => half the HBM bytes).
    o1 = jnp.asarray(output1)                                      # (B, D)
    o2 = jnp.asarray(output2)                                      # (B, D)
    f1 = jnp.asarray(feat1)                                        # (B, F)
    f2 = jnp.asarray(feat2)                                        # (B, F)

    # Merged narrow side inputs: one (B, 2) f32 array instead of two (B, 1).
    tgt = jnp.asarray(target, jnp.float32).reshape(B)
    cm = jnp.asarray(cm_gathered, jnp.float32).reshape(B)
    c = jnp.stack([tgt * cm, (1.0 - tgt) * (1.0 - tgt)], axis=1)   # (B, 2)

    # Label-match count hoisted out of the kernel (plain XLA).
    l1 = jnp.asarray(label1, jnp.int32).reshape(B)
    l2 = jnp.asarray(label2, jnp.int32).reshape(B)
    ct_sum = jnp.sum((l1 == l2).astype(jnp.float32))

    inv_count = 1.0 / float(B * B) if size_average else 1.0
    coef1 = 0.5 * inv_count
    coef2 = 0.5 * float(B) / float(global_mean) * inv_count

    # ---- VMEM-budget-aware tile picker -------------------------------------
    big_itemsize = max(jnp.dtype(o1.dtype).itemsize, jnp.dtype(f1.dtype).itemsize)
    try:
        vmem_cap = int(pltpu.get_tpu_info().vmem_capacity_bytes)
    except Exception:
        vmem_cap = 64 << 20          # conservative fallback (v7x per-TC physical)

    # Live, double-buffered block bytes per tile row.
    per_row = 2 * 2 * D * big_itemsize          # output1/output2
    per_row += 2 * 2 * F * big_itemsize         # feat1/feat2
    per_row += 2 * 128 * 4                      # (tb,2) f32 c, lane-padded to 128
    budget = max(1 << 20, min(vmem_cap // 2, 28 << 20) - (4 << 20))   # ~24 MiB

    b_ceil = -(-B // 8) * 8
    tb = max(8, min(2048, (budget // per_row) // 8 * 8))
    tb = min(tb, b_ceil)                         # tb is always a multiple of 8

    b_pad = -(-B // tb) * tb
    num_tiles = b_pad // tb
    pad = b_pad - B
    if pad:
        # Padded rows contribute exactly zero and never hit 0*inf:
        # distances = 0, featuredis = F > 0, target*cm = (1-target)^2 = 0.
        o1 = jnp.pad(o1, ((0, pad), (0, 0)))
        o2 = jnp.pad(o2, ((0, pad), (0, 0)))
        f1 = jnp.pad(f1, ((0, pad), (0, 0)), constant_values=1)
        f2 = jnp.pad(f2, ((0, pad), (0, 0)))
        c = jnp.pad(c, ((0, pad), (0, 0)))

    live_bytes = per_row * tb + (1 << 20)
    vmem_limit = int(min(max(32 << 20, live_bytes + (8 << 20)),
                         max(vmem_cap - (16 << 20), 16 << 20)))

    kernel = functools.partial(_uwcs_kernel, float(margin), _prefers_f32_upcast())

    partials = pl.pallas_call(
        kernel,
        out_shape=jax.ShapeDtypeStruct((1, 128 * num_tiles), jnp.float32),
        grid=(num_tiles,),
        in_specs=[
            pl.BlockSpec((tb, D), lambda i: (i, 0)),   # output1
            pl.BlockSpec((tb, D), lambda i: (i, 0)),   # output2
            pl.BlockSpec((tb, F), lambda i: (i, 0)),   # feat1
            pl.BlockSpec((tb, F), lambda i: (i, 0)),   # feat2
            pl.BlockSpec((tb, 2), lambda i: (i, 0)),   # [target*cm, (1-target)^2]
        ],
        out_specs=pl.BlockSpec((1, 128), lambda i: (0, i)),
        compiler_params=pltpu.CompilerParams(
            dimension_semantics=("parallel",),          # v7x: shard tiles across 2 TCs
            vmem_limit_bytes=vmem_limit),
    )(o1, o2, f1, f2, c)

    # Tiny final reduce + scalar combine in XLA (independent per-tile partials).
    partials = partials.reshape(num_tiles, 128)
    sums = jnp.sum(partials, axis=0)
    row_total = sums[0]
    t2_total = sums[1]
    return coef1 * ct_sum * row_total + coef2 * t2_total


def _reference_numpy(output1, output2, feat1, feat2, target, cm_gathered,
                     label1, label2, margin, global_mean):
    distances = np.sum((output2 - output1) ** 2, axis=1).astype(np.float32)
    featuredis = np.sum((feat1 - feat2) ** 2, axis=1).astype(np.float32)
    ctarget = (label1 == label2).astype(np.float32).reshape(-1, 1)
    loss = (0.5 * distances * target * ctarget * cm_gathered / featuredis +
            0.5 * (1.0 - target) * (1.0 - target) *
            np.maximum(margin - distances, 0.0) * featuredis / global_mean)
    return float(loss.mean())


if __name__ == "__main__":
    B, D, F = 8, 32, 16          # batch pairs, embedding dim, cluster feature dim
    num_ids, num_classes = 6, 4  # num_classes < B so center_mean[label1] indexing is valid
    margin = 0.7
    global_mean = 1.3

    key = jax.random.PRNGKey(0)
    k_o1, k_o2, k_feat, k_cm, k_tgt, k_lab = jax.random.split(key, 6)

    output1 = np.asarray(jax.random.normal(k_o1, (B, D), jnp.float32))
    output2 = np.asarray(jax.random.normal(k_o2, (B, D), jnp.float32))

    # TODO(synk): the iddict / center_mean python-dict lookups of the original
    # module have no Pallas equivalent; they are resolved to dense arrays on the
    # host here (exactly what the PyTorch module does before its tensor math).
    id_features = np.asarray(jax.random.normal(k_feat, (num_ids, F), jnp.float32))
    id_labels = np.asarray(jax.random.randint(k_lab, (num_ids,), 0, num_classes))
    iddict = {str(i): {"feature": id_features[i], "label": int(id_labels[i])}
              for i in range(num_ids)}
    cm_vals = np.asarray(jax.random.uniform(k_cm, (num_classes,), jnp.float32, 0.5, 2.0))
    center_mean = {str(c): float(cm_vals[c]) for c in range(num_classes)}

    id1 = np.arange(B) % num_ids
    id2 = (np.arange(B) + 1) % num_ids          # guarantees featuredis > 0
    target = np.asarray(jax.random.bernoulli(k_tgt, 0.5, (B,))).astype(np.float32)

    record1 = [iddict[str(int(i))] for i in id1]
    record2 = [iddict[str(int(i))] for i in id2]
    feat1 = np.stack([r["feature"] for r in record1]).astype(np.float32)   # (B, F)
    feat2 = np.stack([r["feature"] for r in record2]).astype(np.float32)   # (B, F)
    label1 = np.asarray([r["label"] for r in record1], np.int32)           # (B,)
    label2 = np.asarray([r["label"] for r in record2], np.int32)           # (B,)
    center_mean_t = np.asarray([center_mean[str(int(l))] for l in label1],
                               np.float32)                                  # (B,)
    # Faithful to the PyTorch module, which indexes the already-gathered
    # per-sample center_mean tensor by the label values again.
    cm_gathered = center_mean_t[label1]

    # --- f32 streaming run (tight tolerance) --------------------------------
    loss = uwcs_loss_pallas(output1, output2, feat1, feat2, target, cm_gathered,
                            label1, label2, margin, global_mean)
    loss = jax.block_until_ready(loss)
    ref = _reference_numpy(output1, output2, feat1, feat2, target, cm_gathered,
                           label1, label2, margin, global_mean)
    assert np.allclose(float(loss), ref, rtol=1e-5, atol=1e-6), (float(loss), ref)

    # --- bf16 streaming run (halves HBM bytes of the big arrays) ------------
    o1_bf = jnp.asarray(output1, jnp.bfloat16)
    o2_bf = jnp.asarray(output2, jnp.bfloat16)
    f1_bf = jnp.asarray(feat1, jnp.bfloat16)
    f2_bf = jnp.asarray(feat2, jnp.bfloat16)
    loss_bf = uwcs_loss_pallas(o1_bf, o2_bf, f1_bf, f2_bf, target, cm_gathered,
                               label1, label2, margin, global_mean)
    loss_bf = jax.block_until_ready(loss_bf)
    ref_bf = _reference_numpy(
        np.asarray(o1_bf.astype(jnp.float32)), np.asarray(o2_bf.astype(jnp.float32)),
        np.asarray(f1_bf.astype(jnp.float32)), np.asarray(f2_bf.astype(jnp.float32)),
        target, cm_gathered, label1, label2, margin, global_mean)
    assert np.allclose(float(loss_bf), ref_bf, rtol=5e-2, atol=1e-3), (float(loss_bf), ref_bf)

    # --- ragged batch (B not a multiple of 8): exercises zero-contribution padding
    Br = 6
    loss_r = uwcs_loss_pallas(output1[:Br], output2[:Br], feat1[:Br], feat2[:Br],
                              target[:Br], cm_gathered[:Br], label1[:Br], label2[:Br],
                              margin, global_mean)
    loss_r = jax.block_until_ready(loss_r)
    ref_r = _reference_numpy(output1[:Br], output2[:Br], feat1[:Br], feat2[:Br],
                             target[:Br], cm_gathered[:Br], label1[:Br], label2[:Br],
                             margin, global_mean)
    assert np.allclose(float(loss_r), ref_r, rtol=1e-5, atol=1e-6), (float(loss_r), ref_r)

    print("KERNEL_OK")
</pallas_src>

<mosaic_0001>
module attributes {stable_mosaic.version = 11 : i64} {
  func.func @_uwcs_kernel(%arg0: i32, %arg1: memref<8x32xf32, #tpu.memory_space<vmem>>, %arg2: memref<8x32xf32, #tpu.memory_space<vmem>>, %arg3: memref<8x16xf32, #tpu.memory_space<vmem>>, %arg4: memref<8x16xf32, #tpu.memory_space<vmem>>, %arg5: memref<8x2xf32, #tpu.memory_space<vmem>>, %arg6: memref<1x128xf32, #tpu.memory_space<vmem>>) attributes {dimension_semantics = [#tpu.dimension_semantics<parallel>], iteration_bounds = array<i64: 1>, scalar_prefetch = 0 : i64, scratch_operands = 0 : i64, tpu.core_type = #tpu.core_type<tc>, window_params = [{transform_indices = @transform_0, window_bounds = array<i64: 8, 32>}, {transform_indices = @transform_1, window_bounds = array<i64: 8, 32>}, {transform_indices = @transform_2, window_bounds = array<i64: 8, 16>}, {transform_indices = @transform_3, window_bounds = array<i64: 8, 16>}, {transform_indices = @transform_4, window_bounds = array<i64: 8, 2>}, {transform_indices = @transform_5, window_bounds = array<i64: 1, 128>}]} {
    %c0 = arith.constant 0 : index
    %c0_0 = arith.constant 0 : index
    %0 = vector.load %arg2[%c0, %c0_0] : memref<8x32xf32, #tpu.memory_space<vmem>>, vector<8x32xf32>
    %c0_1 = arith.constant 0 : index
    %c0_2 = arith.constant 0 : index
    %1 = vector.load %arg1[%c0_1, %c0_2] : memref<8x32xf32, #tpu.memory_space<vmem>>, vector<8x32xf32>
    %2 = arith.subf %0, %1 : vector<8x32xf32>
    %c0_3 = arith.constant 0 : index
    %c0_4 = arith.constant 0 : index
    %3 = vector.load %arg3[%c0_3, %c0_4] : memref<8x16xf32, #tpu.memory_space<vmem>>, vector<8x16xf32>
    %c0_5 = arith.constant 0 : index
    %c0_6 = arith.constant 0 : index
    %4 = vector.load %arg4[%c0_5, %c0_6] : memref<8x16xf32, #tpu.memory_space<vmem>>, vector<8x16xf32>
    %5 = arith.subf %3, %4 : vector<8x16xf32>
    %6 = arith.mulf %2, %2 : vector<8x32xf32>
    %cst = arith.constant dense<0.000000e+00> : vector<8xf32>
    %7 = vector.multi_reduction <add>, %6, %cst [1] : vector<8x32xf32> to vector<8xf32>
    %8 = vector.shape_cast %7 : vector<8xf32> to vector<8x1xf32>
    %9 = arith.mulf %5, %5 : vector<8x16xf32>
    %cst_7 = arith.constant dense<0.000000e+00> : vector<8xf32>
    %10 = vector.multi_reduction <add>, %9, %cst_7 [1] : vector<8x16xf32> to vector<8xf32>
    %11 = vector.shape_cast %10 : vector<8xf32> to vector<8x1xf32>
    %c0_8 = arith.constant 0 : index
    %c0_9 = arith.constant 0 : index
    %12 = vector.load %arg5[%c0_8, %c0_9] : memref<8x2xf32, #tpu.memory_space<vmem>>, vector<8x2xf32>
    %13 = vector.extract_strided_slice %12 {offsets = [0, 0], sizes = [8, 1], strides = [1, 1]} : vector<8x2xf32> to vector<8x1xf32>
    %14 = vector.extract_strided_slice %12 {offsets = [0, 1], sizes = [8, 1], strides = [1, 1]} : vector<8x2xf32> to vector<8x1xf32>
    %15 = tpu.reciprocal %11 : vector<8x1xf32> -> vector<8x1xf32>
    %16 = arith.mulf %8, %13 : vector<8x1xf32>
    %17 = arith.mulf %16, %15 : vector<8x1xf32>
    %cst_10 = arith.constant 0.699999988 : f32
    %18 = vector.broadcast %cst_10 : f32 to vector<8x1xf32>
    %19 = arith.subf %18, %8 : vector<8x1xf32>
    %cst_11 = arith.constant 0.000000e+00 : f32
    %20 = vector.broadcast %cst_11 : f32 to vector<8x1xf32>
    %21 = arith.maximumf %19, %20 : vector<8x1xf32>
    %22 = arith.mulf %14, %21 : vector<8x1xf32>
    %23 = arith.mulf %22, %11 : vector<8x1xf32>
    %24 = vector.shape_cast %17 : vector<8x1xf32> to vector<1x8x1xf32>
    %cst_12 = arith.constant dense<0.000000e+00> : vector<1xf32>
    %25 = vector.multi_reduction <add>, %24, %cst_12 [1, 2] : vector<1x8x1xf32> to vector<1xf32>
    %26 = vector.shape_cast %25 : vector<1xf32> to vector<1x1x1xf32>
    %27 = vector.extract %26[0, 0, 0] : f32 from vector<1x1x1xf32>
    %28 = vector.shape_cast %23 : vector<8x1xf32> to vector<1x8x1xf32>
    %cst_13 = arith.constant dense<0.000000e+00> : vector<1xf32>
    %29 = vector.multi_reduction <add>, %28, %cst_13 [1, 2] : vector<1x8x1xf32> to vector<1xf32>
    %30 = vector.shape_cast %29 : vector<1xf32> to vector<1x1x1xf32>
    %31 = vector.extract %30[0, 0, 0] : f32 from vector<1x1x1xf32>
    %32 = tpu.iota {dimensions = array<i32: 1>} : vector<1x128xi32>
    %c0_i32 = arith.constant 0 : i32
    %33 = vector.broadcast %c0_i32 : i32 to vector<1x128xi32>
    %34 = arith.cmpi eq, %32, %33 : vector<1x128xi32>
    %c1_i32 = arith.constant 1 : i32
    %35 = vector.broadcast %c1_i32 : i32 to vector<1x128xi32>
    %36 = arith.cmpi eq, %32, %35 : vector<1x128xi32>
    %cst_14 = arith.constant 0.000000e+00 : f32
    %37 = vector.broadcast %31 : f32 to vector<1x128xf32>
    %38 = vector.broadcast %cst_14 : f32 to vector<1x128xf32>
    %39 = arith.select %36, %37, %38 : vector<1x128xi1>, vector<1x128xf32>
    %40 = vector.broadcast %27 : f32 to vector<1x128xf32>
    %41 = arith.select %34, %40, %39 : vector<1x128xi1>, vector<1x128xf32>
    %c0_15 = arith.constant 0 : index
    %c0_16 = arith.constant 0 : index
    %42 = vector.load %arg6[%c0_15, %c0_16] : memref<1x128xf32, #tpu.memory_space<vmem>>, vector<1x128xf32>
    tpu.vector_store %arg6[%c0_15, %c0_16], %41 {strides = array<i32>} : memref<1x128xf32, #tpu.memory_space<vmem>>, vector<1x128xf32>,
    return
  }
  func.func @transform_0(%arg0: i32) -> (i32, i32) {
    %c0_i32 = arith.constant 0 : i32
    %c0_i32_0 = arith.constant 0 : i32
    return %arg0, %c0_i32 : i32, i32
  }
  func.func @transform_1(%arg0: i32) -> (i32, i32) {
    %c0_i32 = arith.constant 0 : i32
    %c0_i32_0 = arith.constant 0 : i32
    return %arg0, %c0_i32 : i32, i32
  }
  func.func @transform_2(%arg0: i32) -> (i32, i32) {
    %c0_i32 = arith.constant 0 : i32
    %c0_i32_0 = arith.constant 0 : i32
    return %arg0, %c0_i32 : i32, i32
  }
  func.func @transform_3(%arg0: i32) -> (i32, i32) {
    %c0_i32 = arith.constant 0 : i32
    %c0_i32_0 = arith.constant 0 : i32
    return %arg0, %c0_i32 : i32, i32
  }
  func.func @transform_4(%arg0: i32) -> (i32, i32) {
    %c0_i32 = arith.constant 0 : i32
    %c0_i32_0 = arith.constant 0 : i32
    return %arg0, %c0_i32 : i32, i32
  }
  func.func @transform_5(%arg0: i32) -> (i32, i32) {
    %c0_i32 = arith.constant 0 : i32
    %c0_i32_0 = arith.constant 0 : i32
    return %c0_i32, %arg0 : i32, i32
  }
}

</mosaic_0001>

<bundles_post_ra>
// kernel: tpu_custom_call.1
= control target key start
LH: loop header
LB: loop body
LE: loop exit
PB: predicated region body
PF: predicated region fallthrough
CT: control target
= control target key end

     0   :  { %10 = vsyncpa [#allocation3], 0  ;;  %s280_s0 = inlined_call_operand.vmem [shape: f32[8,32], index: 0, kind: input, shape index: {}]   ;;  %s281_s1 = inlined_call_operand.hbm [shape: f32[8,32], index: 1, kind: input, shape index: {}]   ;;  %s282_s2 = inlined_call_operand.vmem [shape: f32[8,16], index: 2, kind: input, shape index: {}]   ;;  %s283_s3 = inlined_call_operand.hbm [shape: f32[8,16], index: 3, kind: input, shape index: {}]   ;;  %s284_s4 = inlined_call_operand.vmem [shape: f32[8,2], index: 4, kind: input, shape index: {}]   ;;  %s285_s5 = inlined_call_operand.hbm [shape: f32[1,128], index: 5, kind: output, shape index: {}]  }
   0x1   :  { %11 = vsyncpa [#allocation6], 0 }
   0x2   :  { %12 = vsyncpa [#allocation4], 0  ;;  %s201_s18 = smov [#allocation2]   ;;  %s202_s20 = smov [#allocation5]  }
   0x3   :  { %s21_s19 = sshll.u32 %s201_s18, 4  ;;  %s33_s21 = sshll.u32 %s202_s20, 4  ;;  %s22_s19 = int_to_ptr.vmem [resolvable:$true] %s21_s19  ;;  %s34_s21 = int_to_ptr.vmem [resolvable:$true] %s33_s21 }
   0x4   :  { %s129_s24 = scalar_lea.hbm %s281_s1, 128 }
   0x5   :  { %p130_p0 = scmp.ne.s32.totalorder %s281_s1, %s129_s24  ;;  %p133_p1 = scmp.lt.u32.totalorder %s129_s24, %s281_s1 }
   0x7   :  { %p135_p2 = pnand %p133_p1, %p130_p0 }
   0x9   :  { %138 = shalt.err (!%p135_p2)
}
   0xa   :  { %s139_s29 = scalar_lea.vmem %s22_s19, 128  ;;  %p144_p4 = scmp.lt.s32.totalorder %s22_s19, %s22_s19 }
   0xb   :  { %p140_p3 = scmp.ne.s32.totalorder %s22_s19, %s139_s29  ;;  %p145_p5 = scmp.lt.s32.totalorder %s139_s29, %s139_s29 }
   0xd   :  { %p146_p6 = por %p145_p5, %p144_p4 }
   0xf   :  { %p147_p7 = pnand %p146_p6, %p140_p3 }
  0x11   :  { %150 = shalt.err (!%p147_p7)
}
  0x12   :  { %24 = dma.hbm_to_vmem [thread:$0]  %s281_s1, 128, %s22_s19, [#allocation3]  }
  0x13   :  { %s151_s9 = scalar_lea.hbm %s283_s3, 128 }
  0x14   :  { %p152_p8 = scmp.ne.s32.totalorder %s283_s3, %s151_s9  ;;  %p155_p9 = scmp.lt.u32.totalorder %s151_s9, %s283_s3 }
  0x16   :  { %p157_p10 = pnand %p155_p9, %p152_p8 }
  0x18   :  { %160 = shalt.err (!%p157_p10)
}
  0x19   :  { %s161_s14 = scalar_lea.vmem %s34_s21, 128  ;;  %p166_p12 = scmp.lt.s32.totalorder %s34_s21, %s34_s21 }
  0x1a   :  { %p162_p11 = scmp.ne.s32.totalorder %s34_s21, %s161_s14  ;;  %p167_p13 = scmp.lt.s32.totalorder %s161_s14, %s161_s14 }
  0x1c   :  { %p168_p0 = por %p167_p13, %p166_p12 }
  0x1e   :  { %p169_p1 = pnand %p168_p0, %p162_p11 }
  0x20   :  { %172 = shalt.err (!%p169_p1)
}
  0x21   :  { %36 = dma.hbm_to_vmem [thread:$0]  %s283_s3, 128, %s34_s21, [#allocation6]  }
  0x22   :  { %195 = dma.done.wait [#allocation3], 128  }
  0x23   :  { %196 = vsyncadd [#allocation3], 4294967168 }
  0x24   :  { %197 = dma.done.wait [#allocation6], 128  }
  0x25   :  { %198 = vsyncadd [#allocation6], 4294967168  ;;  %v45_v0 = vld [vmem:[#allocation2] sm:$0xff]  ;;  %v49_v4 = vld [vmem:[#allocation5] sm:$0xff]  ;;  %vm52_vm0 = vcmask 261120   ;;  %vm57_vm1 = vcmask 130048   ;;  %v94_v37 = vlaneseq }
  0x26   :  { %v46_v1 = vld [vmem:[%s280_s0] sm:$0xff]  ;;  %vm69_vm2 = vcmask 7168   ;;  %s204_s20 = smov [#allocation7]  }
  0x27   :  { %v48_v2 = vld [vmem:[%s282_s2] sm:$0xff]  ;;  %v47_v3 = vsub.f32 %v45_v0, %v46_v1  ;;  %s203_s2 = smov 127   ;;  %v95_v38 = vand.u32 127, %v94_v37  ;;  %s109_s21 = sshll.u32 %s204_s20, 4  ;;  %s110_s21 = int_to_ptr.vmem [resolvable:$true] %s109_s21 }
  0x28   :  { %v50_v5 = vsub.f32 %v48_v2, %v49_v4  ;;  %v61_v13 = vld [vmem:[%s284_s4] sm:$0xff]  ;;  %s173_s23 = scalar_lea.vmem %s110_s21, 16  ;;  %s177_s24 = scalar_lea.vmem %s110_s21, 32 }
  0x29   :  { %v51_v6 = vmul.f32 %v47_v3, %v47_v3  ;;  %vm97_vm3 = vcmp.eq.s32.totalorder %v95_v38, 1  ;;  %vm96_vm4 = vcmp.eq.s32.totalorder %v95_v38, 0  ;;  %p174_p2 = scmp.ne.s32.totalorder %s110_s21, %s173_s23  ;;  %p178_p3 = scmp.lt.s32.totalorder %s110_s21, %s110_s21 }
  0x2a   :  { %v56_v7 = vmul.f32 %v50_v5, %v50_v5  ;;  %p179_p4 = scmp.lt.s32.totalorder %s177_s24, %s173_s23 }
  0x2b   :  { %v53_v8 = vsel %vm52_vm0, %v51_v6, 0.0 }
  0x2c   :  { %54 = vadd.xlane.f32.xlu0 %v53_v8  ;;  %v58_v9 = vsel %vm57_vm1, %v56_v7, 0.0  ;;  %p180_p5 = por %p179_p4, %p178_p3 }
  0x2e   :  { %p181_p6 = pnand %p180_p5, %p174_p2 }
  0x30   :  { %59 = vadd.xlane.f32.xlu0 %v58_v9 }
  0xb9   :  { %v55_v10 = vpop.xlane.xlu0 %54 }
  0xba   :  { %v65_v11 = vsub.f32 0.7, %v55_v10  ;;  %v63_v18 = vmul.f32 %v61_v13, %v55_v10 }
  0xbc   :  { %v66_v12 = vmax.f32 %v65_v11, 0.0 }
  0xbd   :  { %v60_v15 = vpop.xlane.xlu0 %59 }
  0xbe   :  { %v67_v14 = vmul.f32 %v66_v12, %v61_v13  ;;  %127 = vrcp.f32 %v60_v15 }
  0xc0   :  { %v68_v16 = vmul.f32 %v67_v14, %v60_v15 }
  0xc2   :  { %81 = vrot.lane.b32.xlu1 %v68_v16, %s203_s2 }
  0xc8   :  { %v128_v17 = vpop.eup %127 }
  0xc9   :  { %v64_v19 = vmul.f32 %v128_v17, %v63_v18 }
  0xcb   :  { %v70_v20 = vsel %vm69_vm2, %v64_v19, 0.0 }
  0xe6   :  { %71 = vadd.xlane.f32.xlu1 %v70_v20 }
 0x134   :  { %v82_v21 = vpop.permute.xlu1 %81 }
 0x135   :  { %v84_v22 = vsel %vm69_vm2, %v82_v21, 0.0 }
 0x136   :  { %85 = vadd.xlane.f32.xlu0 %v84_v22 }
 0x173   :  { %v72_v23 = vpop.xlane.xlu1 %71 }
 0x174   :  { %v73_v24 = vrot.slane %v72_v23, 4 }
 0x176   :  { %v74_v25 = vadd.f32 %v73_v24, %v72_v23 }
 0x178   :  { %v75_v26 = vrot.slane %v74_v25, 2 }
 0x17a   :  { %v76_v27 = vadd.f32 %v75_v26, %v74_v25 }
 0x17c   :  { %v77_v28 = vrot.slane %v76_v27, 1 }
 0x17e   :  { %v78_v29 = vadd.f32 %v77_v28, %v76_v27 }
 0x180   :  { %119 = vpush %v78_v29 }
 0x1b1   :  { %s120_s4 = spop %119 }
 0x1b2   :  { %v100_v40 = vstv %s120_s4 }
 0x1c3   :  { %v86_v30 = vpop.xlane.xlu0 %85 }
 0x1c4   :  { %v87_v31 = vrot.slane %v86_v30, 4 }
 0x1c6   :  { %v88_v32 = vadd.f32 %v87_v31, %v86_v30 }
 0x1c8   :  { %v89_v33 = vrot.slane %v88_v32, 2 }
 0x1ca   :  { %v90_v34 = vadd.f32 %v89_v33, %v88_v32 }
 0x1cc   :  { %v91_v35 = vrot.slane %v90_v34, 1 }
 0x1ce   :  { %v92_v36 = vadd.f32 %v91_v35, %v90_v34 }
 0x1d0   :  { %121 = vpush %v92_v36 }
 0x201   :  { %s122_s22 = spop %121 }
 0x202   :  { %v98_v39 = vstv %s122_s22 }
 0x203   :  { %v99_v41 = vsel %vm97_vm3, %v98_v39, 0.0 }
 0x204   :  { %v101_v42 = vsel %vm96_vm4, %v100_v40, %v99_v41 }
 0x205   :  { %102 = vst [vmem:[#allocation7] sm:$0x1] %v101_v42 }
 0x206   :  { %184 = shalt.err (!%p181_p6)
}
 0x207   :  { %s185_s27 = scalar_lea.hbm %s285_s5, 16 }
 0x208   :  { %p186_p7 = scmp.ne.s32.totalorder %s285_s5, %s185_s27  ;;  %p189_p8 = scmp.lt.u32.totalorder %s185_s27, %s285_s5 }
 0x20a   :  { %p191_p9 = pnand %p189_p8, %p186_p7 }
 0x20c   :  { %194 = shalt.err (!%p191_p9)
}
 0x20d   :  { %112 = dma.vmem_to_hbm [thread:$0]  %s110_s21, 16, %s285_s5, [#allocation4]  }
 0x20e   :  { %199 = dma.done.wait [#allocation4], 16  }
 0x20f   :  { %200 = vsyncadd [#allocation4], 4294967280 }
 0x210   :  { %116 = vsyncpa [#allocation3], 1 }
 0x211   :  { %117 = vsyncpa [#allocation6], 1 }
 0x212   :  { %118 = vsyncpa [#allocation4], 1 }

</bundles_post_ra>
